<compile_context>
chip_gen: v6e
topology: v6e:2x2x1
jax: 0.10.0
libtpu: 0.0.40
codegen_flags: <defaults>
</compile_context>

<pallas_src>
import jax
import jax.numpy as jnp
from jax.experimental import pallas as pl
from jax.experimental.pallas import tpu as pltpu


def _split_kernel(x_ref, s0_ref, s1_ref):
    # x_ref block: (tn, 2*HW).  Pure lane-slice copies; HW is the full output
    # lane width so stores are dense, unmasked vst when HW % 128 == 0.
    hw = s0_ref.shape[-1]
    s0_ref[...] = x_ref[:, :hw]
    s1_ref[...] = x_ref[:, hw:]


def _choose_tn(n, row_bytes, target_bytes=8 << 20):
    """Rows per tile: multiple of 8, input tile <= target_bytes.
    If the whole batch fits in one tile, use it (block == full dim is always
    legal); otherwise grid = cdiv(n, tn) and Pallas masks the ragged tail."""
    cap = (target_bytes // max(1, row_bytes)) // 8 * 8
    cap = max(8, cap)
    if n <= cap:
        return n
    return cap


def split_cat_model(x, use_pallas=None):
    """x: (N, 2, H, W). Returns (full, (slice0, slice1)) matching the torch module."""
    N, C, H, W = x.shape
    assert C == 2, "split sizes [1, 1] along dim=1 require exactly 2 channels"
    HW = H * W

    # Lane-dense 2-D view: (N, 2*HW).
    x2 = x.reshape(N, C * HW)
    itemsize = jnp.dtype(x.dtype).itemsize
    total_bytes = N * C * HW * itemsize

    if use_pallas is None:
        # Tiny tensors: pallas_call launch overhead dwarfs the few-KiB copy.
        use_pallas = total_bytes >= (1 << 20)

    if not use_pallas:
        s0 = x2[:, :HW]
        s1 = x2[:, HW:]
    else:
        tn = _choose_tn(N, row_bytes=C * HW * itemsize)
        grid = (pl.cdiv(N, tn),)

        s0, s1 = pl.pallas_call(
            _split_kernel,
            out_shape=(
                jax.ShapeDtypeStruct((N, HW), x.dtype),
                jax.ShapeDtypeStruct((N, HW), x.dtype),
            ),
            grid=grid,
            in_specs=[
                pl.BlockSpec((tn, C * HW), lambda n: (n, 0)),
            ],
            out_specs=(
                pl.BlockSpec((tn, HW), lambda n: (n, 0)),
                pl.BlockSpec((tn, HW), lambda n: (n, 0)),
            ),
            compiler_params=pltpu.CompilerParams(
                dimension_semantics=("parallel",),
                # Double-buffered footprint ~= 4x input tile (~32 MiB at the
                # 8 MiB cap); raise past v5e/v6e scoped defaults, stay under
                # v7x's 64 MiB physical VMEM.
                vmem_limit_bytes=48 << 20,
            ),
        )(x2)

    s0 = s0.reshape(N, 1, H, W)
    s1 = s1.reshape(N, 1, H, W)

    # split+cat chain is the identity; JAX arrays are immutable so returning x
    # directly is semantically equivalent to torch's freshly cat'ed tensor.
    full = x
    return full, (s0, s1)


if __name__ == "__main__":
    key = jax.random.PRNGKey(0)
    # Small shape consistent with the module: split [1,1] along dim=1 needs C=2.
    x = jax.random.normal(key, (2, 2, 16, 16), dtype=jnp.float32)

    # Exercise the Pallas path explicitly (auto heuristic would take the
    # XLA fast path at this tiny size).
    full, (s0, s1) = split_cat_model(x, use_pallas=True)
    jax.block_until_ready((full, s0, s1))
    assert jnp.allclose(full, x), "split+cat chain should be identity"
    assert jnp.allclose(s0, x[:, 0:1]), "first split chunk mismatch"
    assert jnp.allclose(s1, x[:, 1:2]), "second split chunk mismatch"

    # Also check the auto (fast-path) route.
    full2, (t0, t1) = split_cat_model(x)
    jax.block_until_ready((full2, t0, t1))
    assert jnp.allclose(full2, x)
    assert jnp.allclose(t0, x[:, 0:1]) and jnp.allclose(t1, x[:, 1:2])

    print("KERNEL_OK")
</pallas_src>

<mosaic_0001>
module attributes {stable_mosaic.version = 11 : i64} {
  func.func @_split_kernel(%arg0: i32, %arg1: memref<2x512xf32, #tpu.memory_space<vmem>>, %arg2: memref<2x256xf32, #tpu.memory_space<vmem>>, %arg3: memref<2x256xf32, #tpu.memory_space<vmem>>) attributes {dimension_semantics = [#tpu.dimension_semantics<parallel>], iteration_bounds = array<i64: 1>, scalar_prefetch = 0 : i64, scratch_operands = 0 : i64, tpu.core_type = #tpu.core_type<tc>, window_params = [{transform_indices = @transform_0, window_bounds = array<i64: 2, 512>}, {transform_indices = @transform_1, window_bounds = array<i64: 2, 256>}, {transform_indices = @transform_2, window_bounds = array<i64: 2, 256>}]} {
    %c0 = arith.constant 0 : index
    %c0_0 = arith.constant 0 : index
    %0 = vector.load %arg1[%c0, %c0_0] : memref<2x512xf32, #tpu.memory_space<vmem>>, vector<2x256xf32>
    %c0_1 = arith.constant 0 : index
    %c0_2 = arith.constant 0 : index
    %1 = vector.load %arg2[%c0_1, %c0_2] : memref<2x256xf32, #tpu.memory_space<vmem>>, vector<2x256xf32>
    tpu.vector_store %arg2[%c0_1, %c0_2], %0 {strides = array<i32>} : memref<2x256xf32, #tpu.memory_space<vmem>>, vector<2x256xf32>,
    %c0_3 = arith.constant 0 : index
    %c256 = arith.constant 256 : index
    %2 = vector.load %arg1[%c0_3, %c256] : memref<2x512xf32, #tpu.memory_space<vmem>>, vector<2x256xf32>
    %c0_4 = arith.constant 0 : index
    %c0_5 = arith.constant 0 : index
    %3 = vector.load %arg3[%c0_4, %c0_5] : memref<2x256xf32, #tpu.memory_space<vmem>>, vector<2x256xf32>
    tpu.vector_store %arg3[%c0_4, %c0_5], %2 {strides = array<i32>} : memref<2x256xf32, #tpu.memory_space<vmem>>, vector<2x256xf32>,
    return
  }
  func.func @transform_0(%arg0: i32) -> (i32, i32) {
    %c0_i32 = arith.constant 0 : i32
    %c0_i32_0 = arith.constant 0 : i32
    return %arg0, %c0_i32 : i32, i32
  }
  func.func @transform_1(%arg0: i32) -> (i32, i32) {
    %c0_i32 = arith.constant 0 : i32
    %c0_i32_0 = arith.constant 0 : i32
    return %arg0, %c0_i32 : i32, i32
  }
  func.func @transform_2(%arg0: i32) -> (i32, i32) {
    %c0_i32 = arith.constant 0 : i32
    %c0_i32_0 = arith.constant 0 : i32
    return %arg0, %c0_i32 : i32, i32
  }
}

</mosaic_0001>

<bundles_post_ra>
// kernel: tpu_custom_call.1
= control target key start
LH: loop header
LB: loop body
LE: loop exit
PB: predicated region body
PF: predicated region fallthrough
CT: control target
= control target key end

     0   :  { %8 = vsyncpa [#allocation3], 0  ;;  %s153_s0 = inlined_call_operand.hbm [shape: f32[2,512], index: 0, kind: input, shape index: {}]   ;;  %s154_s1 = inlined_call_operand.hbm [shape: f32[2,256], index: 1, kind: output, shape index: {0}]   ;;  %s155_s2 = inlined_call_operand.hbm [shape: f32[2,256], index: 2, kind: output, shape index: {1}]  }
   0x1   :  { %9 = vsyncpa [#allocation4], 0 }
   0x2   :  { %10 = vsyncpa [#allocation7], 0  ;;  %s126_s9 = smov [#allocation2]  }
   0x3   :  { %s17_s10 = sshll.u32 %s126_s9, 4  ;;  %s18_s10 = int_to_ptr.vmem [resolvable:$true] %s17_s10 }
   0x4   :  { %s68_s11 = scalar_lea.vmem %s18_s10, 128  ;;  %p73_p1 = scmp.lt.s32.totalorder %s18_s10, %s18_s10 }
   0x5   :  { %p69_p0 = scmp.ne.s32.totalorder %s18_s10, %s68_s11  ;;  %p74_p2 = scmp.lt.s32.totalorder %s68_s11, %s68_s11 }
   0x7   :  { %p75_p3 = por %p74_p2, %p73_p1 }
   0x9   :  { %p76_p4 = pnand %p75_p3, %p69_p0 }
   0xb   :  { %79 = shalt.err (!%p76_p4)
}
   0xc   :  { %20 = dma.hbm_to_vmem [thread:$0]  %s153_s0, 128, %s18_s10, [#allocation3]  }
   0xd   :  { %120 = dma.done.wait [#allocation3], 128  }
   0xe   :  { %121 = vsyncadd [#allocation3], 4294967168  ;;  %s127_s14 = smov [#allocation5]   ;;  %s128_s16 = smov [#allocation6]   ;;  %v24_v0 = vld [vmem:[#allocation2] sm:$0xf] }
   0xf   :  { %s34_s15 = sshll.u32 %s127_s14, 4  ;;  %s44_s17 = sshll.u32 %s128_s16, 4  ;;  %v26_v1 = vld [vmem:[#allocation2 + $0x4] sm:$0xf]  ;;  %25 = vst [vmem:[#allocation5] sm:$0xf] %v24_v0  ;;  %s35_s15 = int_to_ptr.vmem [resolvable:$true] %s34_s15  ;;  %s45_s17 = int_to_ptr.vmem [resolvable:$true] %s44_s17 }
  0x10   :  { %27 = vst [vmem:[#allocation6] sm:$0xf] %v26_v1  ;;  %s80_s18 = scalar_lea.vmem %s35_s15, 64  ;;  %p85_p6 = scmp.lt.s32.totalorder %s35_s15, %s35_s15 }
  0x11   :  { %p81_p5 = scmp.ne.s32.totalorder %s35_s15, %s80_s18  ;;  %p86_p7 = scmp.lt.s32.totalorder %s80_s18, %s80_s18 }
  0x13   :  { %p87_p8 = por %p86_p7, %p85_p6 }
  0x15   :  { %p88_p9 = pnand %p87_p8, %p81_p5 }
  0x17   :  { %91 = shalt.err (!%p88_p9)
}
  0x18   :  { %37 = dma.vmem_to_hbm [thread:$0]  %s35_s15, 64, %s154_s1, [#allocation4]  }
  0x19   :  { %s100_s20 = scalar_lea.vmem %s45_s17, 64  ;;  %p105_p11 = scmp.lt.s32.totalorder %s45_s17, %s45_s17 }
  0x1a   :  { %p101_p10 = scmp.ne.s32.totalorder %s45_s17, %s100_s20  ;;  %p106_p12 = scmp.lt.s32.totalorder %s100_s20, %s100_s20 }
  0x1c   :  { %p107_p13 = por %p106_p12, %p105_p11 }
  0x1e   :  { %p108_p0 = pnand %p107_p13, %p101_p10 }
  0x20   :  { %111 = shalt.err (!%p108_p0)
}
  0x21   :  { %47 = dma.vmem_to_hbm [thread:$0]  %s45_s17, 64, %s155_s2, [#allocation7]  }
  0x22   :  { %122 = dma.done.wait [#allocation4], 64  }
  0x23   :  { %123 = vsyncadd [#allocation4], 4294967232 }
  0x24   :  { %124 = dma.done.wait [#allocation7], 64  }
  0x25   :  { %125 = vsyncadd [#allocation7], 4294967232 }
  0x26   :  { %54 = vsyncpa [#allocation3], 1 }
  0x27   :  { %55 = vsyncpa [#allocation4], 1 }
  0x28   :  { %56 = vsyncpa [#allocation7], 1 }

</bundles_post_ra>
